<compile_context>
chip_gen: v7x
topology: tpu7x:2x2x1
jax: 0.10.0
libtpu: 0.0.40
codegen_flags: <defaults>
</compile_context>

<pallas_src>
import functools

import jax
import jax.numpy as jnp
from jax.experimental import pallas as pl
from jax.experimental.pallas import tpu as pltpu


def _round_up(n, m):
    return ((n + m - 1) // m) * m


def _cdiv(a, b):
    return (a + b - 1) // b


def channel_attention_kernel(x_ref, w1_ref, w2_ref, o_ref, sum_ref, max_ref,
                             *, C, L, TL, AW, n_l):
    # x_ref   : (1, C, TL)   current batch row, current L tile (native layout:
    #                         C on sublanes, L on the 128-lane axis).
    # w1_ref  : (Hp, C)      fc1 weight, hidden dim zero-padded to Hp.
    # w2_ref  : (C, Hp)      fc2 weight, hidden dim zero-padded to Hp.
    # o_ref   : (1, C, 1)    per-batch attention vector (PyTorch output layout).
    # sum_ref : (C, AW) f32  running elementwise-sum accumulator (VMEM scratch).
    # max_ref : (C, AW) f32  running elementwise-max accumulator (VMEM scratch).
    l_idx = pl.program_id(1)
    last = n_l - 1
    tail = L - last * TL                     # valid columns in final tile (1..TL)

    def fold_tile(num_valid):
        """Partial sum/max over the `num_valid` leading columns of this tile.

        Pure vld + VALU: AW-wide lane chunks are element-wise accumulated into
        (C, AW) carries; no cross-lane reduction here (done once at finalize).
        Only the (statically known) ragged remainder chunk is masked.
        """
        n_full = num_valid // AW
        rem = num_valid - n_full * AW        # remainder only ever on last tile
        psum = None
        pmax = None
        for g in range(n_full):              # static unroll, static offsets
            chunk = x_ref[0, :, pl.ds(g * AW, AW)].astype(jnp.float32)
            psum = chunk if psum is None else psum + chunk
            pmax = chunk if pmax is None else jnp.maximum(pmax, chunk)
        if rem > 0:
            chunk = x_ref[0, :, pl.ds(n_full * AW, AW)].astype(jnp.float32)
            lane = jax.lax.broadcasted_iota(jnp.int32, (C, AW), 1)
            valid = lane < rem
            csum = jnp.where(valid, chunk, 0.0)
            cmax = jnp.where(valid, chunk, -jnp.inf)
            psum = csum if psum is None else psum + csum
            pmax = cmax if pmax is None else jnp.maximum(pmax, cmax)
        return psum, pmax

    def accumulate(psum, pmax):
        @pl.when(l_idx == 0)
        def _():
            sum_ref[...] = psum
            max_ref[...] = pmax

        @pl.when(l_idx > 0)
        def _():
            sum_ref[...] = sum_ref[...] + psum
            max_ref[...] = jnp.maximum(max_ref[...], pmax)

    if tail == TL:
        # L divides evenly into tiles: no masking anywhere.
        accumulate(*fold_tile(TL))
    else:
        @pl.when(l_idx < last)
        def _():
            accumulate(*fold_tile(TL))       # unmasked fast path

        @pl.when(l_idx == last)
        def _():
            accumulate(*fold_tile(tail))     # masked ragged tail only

    @pl.when(l_idx == last)
    def _():
        # Single cross-lane reduction of the running accumulators.
        avg = jnp.sum(sum_ref[...], axis=1, keepdims=True) * (1.0 / L)   # (C, 1)
        mx = jnp.max(max_ref[...], axis=1, keepdims=True)                # (C, 1)

        # Pack avg / max into lanes 0 / 1 of one (C, 128) operand so a single
        # fc1+fc2 pass (two MXU-aligned matmuls) covers both pooling branches.
        lane = jax.lax.broadcasted_iota(jnp.int32, (C, 128), 1)
        v = jnp.where(lane == 0, avg, jnp.where(lane == 1, mx, 0.0))     # (C, 128)

        w1 = w1_ref[...].astype(jnp.float32)                             # (Hp, C)
        w2 = w2_ref[...].astype(jnp.float32)                             # (C, Hp)
        h = jnp.maximum(jnp.dot(w1, v, preferred_element_type=jnp.float32), 0.0)
        y = jnp.dot(w2, h, preferred_element_type=jnp.float32)           # (C, 128)

        # Lanes >= 2 of v are zero => lanes >= 2 of y are zero (no bias), so a
        # full lane-sum of y equals avg_out + max_out.
        att = jax.nn.sigmoid(jnp.sum(y, axis=1, keepdims=True))          # (C, 1)
        o_ref[0] = att.astype(o_ref.dtype)


def channel_attention(x, w1, w2, *, tl=None, block_bytes=2 * 1024 * 1024):
    """ChannelAttention forward.

    x  : (B, C, L)  input (PyTorch NCL layout, consumed as-is -- no copy)
    w1 : (H, C)     fc1.weight[:, :, 0]   (H = C // ratio)
    w2 : (C, H)     fc2.weight[:, :, 0]
    returns (B, C, 1), matching the PyTorch module output.
    """
    B, C, L = x.shape
    H = w1.shape[0]
    itemsize = x.dtype.itemsize
    LANE = 128
    MAX_CHUNKS = 64                          # cap on per-tile static unroll

    # ---- L tiling: large lane-aligned tiles streamed on an "arbitrary" axis.
    if tl is None:
        tl = max(LANE, block_bytes // max(C * itemsize, 1))

    if L <= LANE:
        TL = AW = L                          # single tiny tile, single chunk
    else:
        # Chunk / accumulator width: lane-aligned, sized so one chunk plus the
        # two (C, AW) carries stay comfortably within the vector registers.
        aw_cap = max(LANE, ((32 * 1024) // max(C * itemsize, 1)) // LANE * LANE)
        AW = max(LANE, min(512, aw_cap, (L // LANE) * LANE, (tl // LANE) * LANE))
        chunks = max(1, min(MAX_CHUNKS, tl // AW, L // AW))
        TL = AW * chunks                     # AW | TL, and TL <= L
    n_l = _cdiv(L, TL)

    # ---- weights: zero-pad the (tiny) hidden dim to a lane multiple so the
    # finalize matmuls are MXU-aligned.  relu(0) rows hit zero columns of w2,
    # so the padding is exact; padded weights are a few KiB only.
    Hp = _round_up(max(H, 128), 128)
    w1p = jnp.zeros((Hp, C), x.dtype).at[:H, :].set(w1.astype(x.dtype))
    w2p = jnp.zeros((C, Hp), x.dtype).at[:, :H].set(w2.astype(x.dtype))

    kernel = functools.partial(channel_attention_kernel,
                               C=C, L=L, TL=TL, AW=AW, n_l=n_l)

    # ---- VMEM budget from actual (tile-padded) buffer sizes + headroom.
    def _padded_bytes(shape, isz):
        s = list(shape)
        s[-1] = _round_up(s[-1], 128)
        if len(s) >= 2:
            s[-2] = _round_up(s[-2], 8)
        n = 1
        for d in s:
            n *= d
        return n * isz

    vmem_need = (2 * _padded_bytes((1, C, TL), itemsize)     # x (double-buffered)
                 + 2 * _padded_bytes((Hp, C), itemsize)       # fc1 weight
                 + 2 * _padded_bytes((C, Hp), itemsize)       # fc2 weight
                 + 2 * _padded_bytes((1, C, 1), itemsize)     # output
                 + 2 * _padded_bytes((C, AW), 4))             # sum/max scratch
    vmem_limit = int(min(96 * 1024 * 1024,
                         max(16 * 1024 * 1024, vmem_need + 8 * 1024 * 1024)))

    return pl.pallas_call(
        kernel,
        out_shape=jax.ShapeDtypeStruct((B, C, 1), x.dtype),
        grid_spec=pltpu.PrefetchScalarGridSpec(
            num_scalar_prefetch=0,
            grid=(B, n_l),
            in_specs=[
                pl.BlockSpec((1, C, TL), lambda b, l: (b, 0, l)),
                pl.BlockSpec((Hp, C), lambda b, l: (0, 0)),    # resident
                pl.BlockSpec((C, Hp), lambda b, l: (0, 0)),    # resident
            ],
            out_specs=pl.BlockSpec((1, C, 1), lambda b, l: (b, 0, 0)),
            scratch_shapes=[
                pltpu.VMEM((C, AW), jnp.float32),   # running sum
                pltpu.VMEM((C, AW), jnp.float32),   # running max
            ],
        ),
        compiler_params=pltpu.CompilerParams(
            dimension_semantics=("parallel", "arbitrary"),
            vmem_limit_bytes=vmem_limit,
        ),
    )(x, w1p, w2p)


def _reference(x, w1, w2):
    avg = jnp.mean(x, axis=-1)
    mx = jnp.max(x, axis=-1)

    def mlp(v):
        h = jnp.maximum(v @ w1.T, 0.0)
        return h @ w2.T

    return jax.nn.sigmoid(mlp(avg) + mlp(mx))[:, :, None]


if __name__ == "__main__":
    # in_planes=32, ratio=16 -> hidden=2; batch B=2 (module defaults).
    B, C, ratio = 2, 32, 16
    H = C // ratio

    key = jax.random.PRNGKey(0)
    kx1, kx2, kx3, k1, k2 = jax.random.split(key, 5)
    # Conv1d(C,H,1) / Conv1d(H,C,1) weights with the kernel dim squeezed out.
    w1 = jax.random.normal(k1, (H, C), dtype=jnp.float32) * 0.1
    w2 = jax.random.normal(k2, (C, H), dtype=jnp.float32) * 0.1

    # Case 1: L=16 -> single full tile (no masking path).
    x1 = jax.random.normal(kx1, (B, C, 16), dtype=jnp.float32)
    o1 = jax.block_until_ready(channel_attention(x1, w1, w2))
    assert o1.shape == (B, C, 1)
    assert jnp.allclose(o1, _reference(x1, w1, w2), atol=2e-5, rtol=2e-5)

    # Case 2: L=300 with tl=128 -> 3 streamed tiles + masked ragged tail.
    x2 = jax.random.normal(kx2, (B, C, 300), dtype=jnp.float32)
    o2 = jax.block_until_ready(channel_attention(x2, w1, w2, tl=128))
    assert jnp.allclose(o2, _reference(x2, w1, w2), atol=2e-5, rtol=2e-5)

    # Case 3: L=3000 with tl=1280 -> multi-chunk tiles + ragged remainder chunk.
    x3 = jax.random.normal(kx3, (B, C, 3000), dtype=jnp.float32)
    o3 = jax.block_until_ready(channel_attention(x3, w1, w2, tl=1280))
    assert jnp.allclose(o3, _reference(x3, w1, w2), atol=2e-5, rtol=2e-5)

    print("KERNEL_OK")
</pallas_src>

<mosaic_0001>
module attributes {stable_mosaic.version = 11 : i64} {
  func.func @channel_attention_kernel(%arg0: i32, %arg1: i32, %arg2: memref<1x32x16xf32, #tpu.memory_space<vmem>>, %arg3: memref<128x32xf32, #tpu.memory_space<vmem>>, %arg4: memref<32x128xf32, #tpu.memory_space<vmem>>, %arg5: memref<1x32x1xf32, #tpu.memory_space<vmem>>, %arg6: memref<32x16xf32, #tpu.memory_space<vmem>>, %arg7: memref<32x16xf32, #tpu.memory_space<vmem>>) attributes {dimension_semantics = [#tpu.dimension_semantics<parallel>, #tpu.dimension_semantics<arbitrary>], iteration_bounds = array<i64: 2, 1>, scalar_prefetch = 0 : i64, scratch_operands = 2 : i64, tpu.core_type = #tpu.core_type<tc>, window_params = [{transform_indices = @transform_0, window_bounds = array<i64: 1, 32, 16>}, {pipeline_mode = #tpu.pipeline_mode<synchronous>, transform_indices = @transform_1, window_bounds = array<i64: 128, 32>}, {pipeline_mode = #tpu.pipeline_mode<synchronous>, transform_indices = @transform_2, window_bounds = array<i64: 32, 128>}, {transform_indices = @transform_3, window_bounds = array<i64: 1, 32, 1>}]} {
    %c0 = arith.constant 0 : index
    %c0_0 = arith.constant 0 : index
    %c0_1 = arith.constant 0 : index
    %0 = vector.load %arg2[%c0, %c0_0, %c0_1] : memref<1x32x16xf32, #tpu.memory_space<vmem>>, vector<1x32x16xf32>
    %1 = vector.shape_cast %0 : vector<1x32x16xf32> to vector<32x16xf32>
    %c0_i32 = arith.constant 0 : i32
    %2 = arith.cmpi eq, %arg1, %c0_i32 : i32
    %3 = arith.extui %2 : i1 to i32
    %c0_i32_2 = arith.constant 0 : i32
    %4 = arith.cmpi ne, %3, %c0_i32_2 : i32
    scf.if %4 {
      %c0_7 = arith.constant 0 : index
      %c0_8 = arith.constant 0 : index
      %11 = vector.load %arg6[%c0_7, %c0_8] : memref<32x16xf32, #tpu.memory_space<vmem>>, vector<32x16xf32>
      tpu.vector_store %arg6[%c0_7, %c0_8], %1 {strides = array<i32>} : memref<32x16xf32, #tpu.memory_space<vmem>>, vector<32x16xf32>,
      %c0_9 = arith.constant 0 : index
      %c0_10 = arith.constant 0 : index
      %12 = vector.load %arg7[%c0_9, %c0_10] : memref<32x16xf32, #tpu.memory_space<vmem>>, vector<32x16xf32>
      tpu.vector_store %arg7[%c0_9, %c0_10], %1 {strides = array<i32>} : memref<32x16xf32, #tpu.memory_space<vmem>>, vector<32x16xf32>,
    } else {
    }
    %c0_i32_3 = arith.constant 0 : i32
    %5 = arith.cmpi sgt, %arg1, %c0_i32_3 : i32
    %6 = arith.extui %5 : i1 to i32
    %c0_i32_4 = arith.constant 0 : i32
    %7 = arith.cmpi ne, %6, %c0_i32_4 : i32
    scf.if %7 {
      %c0_7 = arith.constant 0 : index
      %c0_8 = arith.constant 0 : index
      %11 = vector.load %arg6[%c0_7, %c0_8] : memref<32x16xf32, #tpu.memory_space<vmem>>, vector<32x16xf32>
      %12 = arith.addf %11, %1 : vector<32x16xf32>
      %c0_9 = arith.constant 0 : index
      %c0_10 = arith.constant 0 : index
      %13 = vector.load %arg6[%c0_9, %c0_10] : memref<32x16xf32, #tpu.memory_space<vmem>>, vector<32x16xf32>
      tpu.vector_store %arg6[%c0_9, %c0_10], %12 {strides = array<i32>} : memref<32x16xf32, #tpu.memory_space<vmem>>, vector<32x16xf32>,
      %c0_11 = arith.constant 0 : index
      %c0_12 = arith.constant 0 : index
      %14 = vector.load %arg7[%c0_11, %c0_12] : memref<32x16xf32, #tpu.memory_space<vmem>>, vector<32x16xf32>
      %15 = arith.maximumf %14, %1 : vector<32x16xf32>
      %c0_13 = arith.constant 0 : index
      %c0_14 = arith.constant 0 : index
      %16 = vector.load %arg7[%c0_13, %c0_14] : memref<32x16xf32, #tpu.memory_space<vmem>>, vector<32x16xf32>
      tpu.vector_store %arg7[%c0_13, %c0_14], %15 {strides = array<i32>} : memref<32x16xf32, #tpu.memory_space<vmem>>, vector<32x16xf32>,
    } else {
    }
    %c0_i32_5 = arith.constant 0 : i32
    %8 = arith.cmpi eq, %arg1, %c0_i32_5 : i32
    %9 = arith.extui %8 : i1 to i32
    %c0_i32_6 = arith.constant 0 : i32
    %10 = arith.cmpi ne, %9, %c0_i32_6 : i32
    scf.if %10 {
      %c0_7 = arith.constant 0 : index
      %c0_8 = arith.constant 0 : index
      %11 = vector.load %arg6[%c0_7, %c0_8] : memref<32x16xf32, #tpu.memory_space<vmem>>, vector<32x16xf32>
      %cst = arith.constant dense<0.000000e+00> : vector<32xf32>
      %12 = vector.multi_reduction <add>, %11, %cst [1] : vector<32x16xf32> to vector<32xf32>
      %13 = vector.shape_cast %12 : vector<32xf32> to vector<32x1xf32>
      %cst_9 = arith.constant 6.250000e-02 : f32
      %14 = vector.broadcast %cst_9 : f32 to vector<32x1xf32>
      %15 = arith.mulf %13, %14 : vector<32x1xf32>
      %c0_10 = arith.constant 0 : index
      %c0_11 = arith.constant 0 : index
      %16 = vector.load %arg7[%c0_10, %c0_11] : memref<32x16xf32, #tpu.memory_space<vmem>>, vector<32x16xf32>
      %cst_12 = arith.constant dense<0xFF800000> : vector<32xf32>
      %17 = vector.multi_reduction <maximumf>, %16, %cst_12 [1] : vector<32x16xf32> to vector<32xf32>
      %18 = vector.shape_cast %17 : vector<32xf32> to vector<32x1xf32>
      %19 = tpu.iota {dimensions = array<i32: 1>} : vector<32x128xi32>
      %c0_i32_13 = arith.constant 0 : i32
      %20 = vector.broadcast %c0_i32_13 : i32 to vector<32x128xi32>
      %21 = arith.cmpi eq, %19, %20 : vector<32x128xi32>
      %c1_i32 = arith.constant 1 : i32
      %22 = vector.broadcast %c1_i32 : i32 to vector<32x128xi32>
      %23 = arith.cmpi eq, %19, %22 : vector<32x128xi32>
      %cst_14 = arith.constant 0.000000e+00 : f32
      %24 = vector.shape_cast %18 : vector<32x1xf32> to vector<32x1xf32>
      %25 = vector.broadcast %24 : vector<32x1xf32> to vector<32x128xf32>
      %26 = vector.broadcast %cst_14 : f32 to vector<32x128xf32>
      %27 = arith.select %23, %25, %26 : vector<32x128xi1>, vector<32x128xf32>
      %28 = vector.shape_cast %15 : vector<32x1xf32> to vector<32x1xf32>
      %29 = vector.broadcast %28 : vector<32x1xf32> to vector<32x128xf32>
      %30 = arith.select %21, %29, %27 : vector<32x128xi1>, vector<32x128xf32>
      %c0_15 = arith.constant 0 : index
      %c0_16 = arith.constant 0 : index
      %31 = vector.load %arg3[%c0_15, %c0_16] : memref<128x32xf32, #tpu.memory_space<vmem>>, vector<128x32xf32>
      %c0_17 = arith.constant 0 : index
      %c0_18 = arith.constant 0 : index
      %32 = vector.load %arg4[%c0_17, %c0_18] : memref<32x128xf32, #tpu.memory_space<vmem>>, vector<32x128xf32>
      %cst_19 = arith.constant dense<0.000000e+00> : vector<128x128xf32>
      %33 = tpu.matmul %31, %30, %cst_19 {dimension_numbers = #tpu.dot_dimension_numbers<[1], [0], [0], [1], [0, 0, 1, 1], [], []>} : vector<128x32xf32>, vector<32x128xf32>, vector<128x128xf32> -> vector<128x128xf32>
      %cst_20 = arith.constant 0.000000e+00 : f32
      %34 = vector.broadcast %cst_20 : f32 to vector<128x128xf32>
      %35 = arith.maximumf %33, %34 : vector<128x128xf32>
      %cst_21 = arith.constant dense<0.000000e+00> : vector<32x128xf32>
      %36 = tpu.matmul %32, %35, %cst_21 {dimension_numbers = #tpu.dot_dimension_numbers<[1], [0], [0], [1], [0, 0, 1, 1], [], []>} : vector<32x128xf32>, vector<128x128xf32>, vector<32x128xf32> -> vector<32x128xf32>
      %cst_22 = arith.constant dense<0.000000e+00> : vector<32xf32>
      %37 = vector.multi_reduction <add>, %36, %cst_22 [1] : vector<32x128xf32> to vector<32xf32>
      %38 = vector.shape_cast %37 : vector<32xf32> to vector<32x1xf32>
      %39 = arith.negf %38 : vector<32x1xf32>
      %40 = math.exp %39 : vector<32x1xf32>
      %cst_23 = arith.constant 1.000000e+00 : f32
      %41 = vector.broadcast %cst_23 : f32 to vector<32x1xf32>
      %42 = arith.addf %41, %40 : vector<32x1xf32>
      %43 = arith.divf %41, %42 : vector<32x1xf32>
      %c0_24 = arith.constant 0 : index
      %c0_25 = arith.constant 0 : index
      %c0_26 = arith.constant 0 : index
      %44 = vector.load %arg5[%c0_24, %c0_25, %c0_26] : memref<1x32x1xf32, #tpu.memory_space<vmem>>, vector<1x32x1xf32>
      %45 = vector.shape_cast %44 : vector<1x32x1xf32> to vector<32x1xf32>
      %46 = vector.shape_cast %43 : vector<32x1xf32> to vector<1x32x1xf32>
      tpu.vector_store %arg5[%c0_24, %c0_25, %c0_26], %46 {strides = array<i32>} : memref<1x32x1xf32, #tpu.memory_space<vmem>>, vector<1x32x1xf32>,
    } else {
    }
    return
  }
  func.func @transform_0(%arg0: i32, %arg1: i32) -> (i32, i32, i32) {
    %c0_i32 = arith.constant 0 : i32
    %c0_i32_0 = arith.constant 0 : i32
    return %arg0, %c0_i32, %arg1 : i32, i32, i32
  }
  func.func @transform_1(%arg0: i32, %arg1: i32) -> (i32, i32) {
    %c0_i32 = arith.constant 0 : i32
    %c0_i32_0 = arith.constant 0 : i32
    %c0_i32_1 = arith.constant 0 : i32
    return %c0_i32, %c0_i32_0 : i32, i32
  }
  func.func @transform_2(%arg0: i32, %arg1: i32) -> (i32, i32) {
    %c0_i32 = arith.constant 0 : i32
    %c0_i32_0 = arith.constant 0 : i32
    %c0_i32_1 = arith.constant 0 : i32
    return %c0_i32, %c0_i32_0 : i32, i32
  }
  func.func @transform_3(%arg0: i32, %arg1: i32) -> (i32, i32, i32) {
    %c0_i32 = arith.constant 0 : i32
    %c0_i32_0 = arith.constant 0 : i32
    %c0_i32_1 = arith.constant 0 : i32
    return %arg0, %c0_i32, %c0_i32_0 : i32, i32, i32
  }
}

</mosaic_0001>

<bundles_post_ra>
// kernel: tpu_custom_call.1
= control target key start
LH: loop header
LB: loop body
LE: loop exit
PB: predicated region body
PF: predicated region fallthrough
CT: control target
= control target key end

     0   :  { %s980_s12 = smov 0   ;;  %s982_s13 = smov 0   ;;  %s1120_s0 = inlined_call_operand.vmem [shape: f32[2,32,16], index: 0, kind: input, shape index: {}]   ;;  %s1121_s1 = inlined_call_operand.vmem [shape: f32[128,32], index: 1, kind: input, shape index: {}]   ;;  %s1122_s2 = inlined_call_operand.vmem [shape: f32[32,128], index: 2, kind: input, shape index: {}]   ;;  %s1123_s3 = inlined_call_operand.vmem [shape: f32[2,32,1], index: 3, kind: output, shape index: {}]  }
   0x1   :  { %s984_s14 = smov 0  }
   0x2 LB: > { %s25_s15 = sadd.s32 1, %s954_s13  ;;  %p717_p0 = scmp.ge.s32.totalorder %s958_s14, 1  ;;  %s958_s14 = sphi %s984_s14, %s13_s14   ;;  %s954_s13 = sphi %s982_s13, %s1125_s13   ;;  %s950_s12 = sphi %s980_s12, %s1124_s12  }
   0x3   : > { %p27_p1 = scmp.ge.s32.totalorder %s25_s15, 2  ;;  %p154_p2 = scmp.lt.s32.totalorder %s958_s14, 3 }
   0x5   : > { %s1127_s15 = smov (%p27_p1, %s25_s15), 0  ;;  %p155_p3 = pnand %p717_p0, %p154_p2 }
   0x6   : > { %p181_p4 = scmp.lt.s32.totalorder (!%p155_p3), %s950_s12, 1  ;;  %vm202_vm0 = vcmask (!%p155_p3), 130048   ;;  %v292_v20 = vld [vmem:[%s1121_s1] sm:$0xff] (!%p155_p3)  ;;  %vm312_vm1 = vcmask (!%p155_p3), 261120   ;;  %v280_v21 = vlaneseq (!%p155_p3)  ;;  %v293_v45 = vld [vmem:[%s1121_s1 + $0x8] sm:$0xff] (!%p155_p3)  ;;  %v294_v46 = vld [vmem:[%s1121_s1 + $0x10] sm:$0xff] (!%p155_p3) }
   0x7   : > { %158 = sbr.rel (%p155_p3) target bundleno = 825 (0x339), region = 32  ;;  %794 = vmatprep.mubr.msk.f32.mxu0 (!%p155_p3), %vm312_vm1, %v292_v20  ;;  %v295_v47 = vld [vmem:[%s1121_s1 + $0x18] sm:$0xff] (!%p155_p3)  ;;  %v296_v48 = vld [vmem:[%s1121_s1 + $0x20] sm:$0xff] (!%p155_p3)  ;;  %v297_v49 = vld [vmem:[%s1121_s1 + $0x28] sm:$0xff] (!%p155_p3)  ;;  %vm639_vm4 = vcmask (!%p155_p3), 7168  }
   0x8   : > { %v281_v22 = vand.u32 (!%p155_p3), 127, %v280_v21  ;;  %v298_v50 = vld [vmem:[%s1121_s1 + $0x30] sm:$0xff] (!%p155_p3)  ;;  %v299_v51 = vld [vmem:[%s1121_s1 + $0x38] sm:$0xff] (!%p155_p3)  ;;  %v300_v52 = vld [vmem:[%s1121_s1 + $0x40] sm:$0xff] (!%p155_p3) }
   0x9   : > { %v301_v53 = vld [vmem:[%s1121_s1 + $0x48] sm:$0xff] (!%p155_p3)  ;;  %v302_v54 = vld [vmem:[%s1121_s1 + $0x50] sm:$0xff] (!%p155_p3)  ;;  %v303_v55 = vld [vmem:[%s1121_s1 + $0x58] sm:$0xff] (!%p155_p3) }
   0xa   : > { %vm283_vm2 = vcmp.eq.s32.totalorder (!%p155_p3), %v281_v22, 1  ;;  %vm282_vm3 = vcmp.eq.s32.totalorder (!%p155_p3), %v281_v22, 0  ;;  %v304_v56 = vld [vmem:[%s1121_s1 + $0x60] sm:$0xff] (!%p155_p3)  ;;  %v305_v57 = vld [vmem:[%s1121_s1 + $0x68] sm:$0xff] (!%p155_p3)  ;;  %v306_v58 = vld [vmem:[%s1121_s1 + $0x70] sm:$0xff] (!%p155_p3) }
   0xb   : > { %v307_v59 = vld [vmem:[%s1121_s1 + $0x78] sm:$0xff] (!%p155_p3)  ;;  %v308_v60 = vld [vmem:[%s1122_s2] sm:$0xff] (!%p155_p3) }
   0xc   : > { %850 = vmatprep.mubr.f32.mxu1 (!%p155_p3), %v308_v60 }
   0xe   : > { %s1129_s12 = smov (!%p181_p4, %s950_s12), 1 }
   0xf   : > { %s744_s16 = sshll.u32 %s1129_s12, 5 }
  0x10   : > { %s188_s19 = scalar_lea.vmem %s1120_s0, %s744_s16  ;;  %s193_s18 = scalar_lea.vmem %s1123_s3, %s744_s16 }
  0x11   : > { %v194_v0 = vld [vmem:[%s188_s19] sm:$0xff]  ;;  %v195_v1 = vld [vmem:[%s188_s19 + $0x8] sm:$0xff]  ;;  %v197_v2 = vld [vmem:[%s188_s19 + $0x18] sm:$0xff] }
  0x12   : > { %207 = vst.msk [vmem:[#allocation3] sm:$0xff] %vm202_vm0, %v194_v0  ;;  %203 = vst.msk [vmem:[#allocation2] sm:$0xff] %vm202_vm0, %v194_v0  ;;  %v196_v3 = vld [vmem:[%s188_s19 + $0x10] sm:$0xff] }
  0x13   : > { %208 = vst.msk [vmem:[#allocation3 + $0x8] sm:$0xff] %vm202_vm0, %v195_v1  ;;  %204 = vst.msk [vmem:[#allocation2 + $0x8] sm:$0xff] %vm202_vm0, %v195_v1 }
  0x14   : > { %206 = vst.msk [vmem:[#allocation2 + $0x18] sm:$0xff] %vm202_vm0, %v197_v2  ;;  %210 = vst.msk [vmem:[#allocation3 + $0x18] sm:$0xff] %vm202_vm0, %v197_v2 }
  0x15   : > { %205 = vst.msk [vmem:[#allocation2 + $0x10] sm:$0xff] %vm202_vm0, %v196_v3  ;;  %209 = vst.msk [vmem:[#allocation3 + $0x10] sm:$0xff] %vm202_vm0, %v196_v3 }
  0x19   : > { %v264_v4 = vld [vmem:[#allocation3] sm:$0xff] }
  0x1a   : > { %v243_v5 = vld [vmem:[#allocation2] sm:$0xff]  ;;  %v265_v6 = vld [vmem:[#allocation3 + $0x8] sm:$0xff]  ;;  %v268_v7 = vsel %vm202_vm0, %v264_v4, -inf }
  0x1b   : > { %v248_v8 = vsel %vm202_vm0, %v243_v5, 0.0  ;;  %v244_v9 = vld [vmem:[#allocation2 + $0x8] sm:$0xff]  ;;  %269 = vmax.xlane.f32.xlu1 %v268_v7  ;;  %v271_v10 = vsel %vm202_vm0, %v265_v6, -inf  ;;  %v246_v12 = vld [vmem:[#allocation2 + $0x18] sm:$0xff] }
  0x1c   : > { %249 = vadd.xlane.f32.xlu0 %v248_v8  ;;  %v251_v11 = vsel %vm202_vm0, %v244_v9, 0.0  ;;  %v245_v13 = vld [vmem:[#allocation2 + $0x10] sm:$0xff]  ;;  %v257_v14 = vsel %vm202_vm0, %v246_v12, 0.0  ;;  %v267_v16 = vld [vmem:[#allocation3 + $0x18] sm:$0xff] }
  0x1d   : > { %v254_v15 = vsel %vm202_vm0, %v245_v13, 0.0  ;;  %v266_v17 = vld [vmem:[#allocation3 + $0x10] sm:$0xff]  ;;  %v277_v18 = vsel %vm202_vm0, %v267_v16, -inf }
  0x1e   : > { %v274_v19 = vsel %vm202_vm0, %v266_v17, -inf }
  0x1f   : > { %272 = vmax.xlane.f32.xlu1 %v271_v10 }
  0x20   : > { %252 = vadd.xlane.f32.xlu0 %v251_v11 }
  0x23   : > { %258 = vadd.xlane.f32.xlu1 %v257_v14 }
  0x24   : > { %255 = vadd.xlane.f32.xlu0 %v254_v15 }
  0x27   : > { %278 = vmax.xlane.f32.xlu1 %v277_v18 }
  0x28   : > { %275 = vmax.xlane.f32.xlu0 %v274_v19 }
  0xa8   : > { %v270_v23 = vpop.xlane.xlu1 %269 }
  0xa9   : > { %v250_v24 = vpop.xlane.xlu0 %249  ;;  %v284_v26 = vsel %vm283_vm2, %v270_v23, 0.0 }
  0xaa   : > { %v260_v25 = vmul.f32 0.0625, %v250_v24 }
  0xac   : > { %v273_v27 = vpop.xlane.xlu1 %272  ;;  %v288_v31 = vsel %vm282_vm3, %v260_v25, %v284_v26 }
  0xad   : > { %v253_v28 = vpop.xlane.xlu0 %252  ;;  %v285_v29 = vsel %vm283_vm2, %v273_v27, 0.0 }
  0xae   : > { %v261_v30 = vmul.f32 0.0625, %v253_v28 }
  0xb0   : > { %v289_v32 = vsel %vm282_vm3, %v261_v30, %v285_v29  ;;  %v259_v33 = vpop.xlane.xlu1 %258 }
  0xb1   : > { %v256_v34 = vpop.xlane.xlu0 %255  ;;  %v856_v35 = vpack.c.bf16 %v289_v32, %v288_v31  ;;  %v263_v36 = vmul.f32 0.0625, %v259_v33 }
  0xb2   : > { %v262_v37 = vmul.f32 0.0625, %v256_v34 }
  0xb3   : > { %857 = vmatprep.subr.bf16.mxu0 %v856_v35 }
  0xb4   : > { %859 = vmatpush3.bf16.msra.mxu0 %v856_v35  ;;  %v279_v38 = vpop.xlane.xlu1 %278 }
  0xb5   : > { %v276_v39 = vpop.xlane.xlu0 %275  ;;  %v287_v40 = vsel %vm283_vm2, %v279_v38, 0.0  ;;  %v310_v38 = vld [vmem:[%s1122_s2 + $0x10] sm:$0xff] }
  0xb6   : > { %v286_v41 = vsel %vm283_vm2, %v276_v39, 0.0  ;;  %v291_v42 = vsel %vm282_vm3, %v263_v36, %v287_v40  ;;  %v311_v39 = vld [vmem:[%s1122_s2 + $0x18] sm:$0xff] }
  0xb7   : > { %v290_v43 = vsel %vm282_vm3, %v262_v37, %v286_v41  ;;  %v309_v37 = vld [vmem:[%s1122_s2 + $0x8] sm:$0xff] }
  0xb8   : > { %v860_v44 = vpack.c.bf16 %v291_v42, %v290_v43 }
  0xba   : > { %861 = vmatprep.subr.bf16.mxu0 %v860_v44 }
  0xbb   : > { %863 = vmatpush3.bf16.msra.mxu0 %v860_v44 }
  0xbe   : > { %795 = vmatmul.mubr.msk.f32.vlgmr.msra.gmra.mrb[0].mxu0 %vm312_vm1, %v293_v45 }
  0xbf   : > { %797 = vmatprep.mubr.msk.f32.mxu0 %vm312_vm1, %v294_v46 }
  0xc2   : > { %798 = vmatmul.mubr.msk.f32.gmra.mrb[2].mxu0 %vm312_vm1, %v295_v47 }
  0xc3   : > { %800 = vmatprep.mubr.msk.f32.mxu0 %vm312_vm1, %v296_v48 }
  0xc6   : > { %801 = vmatmul.mubr.msk.f32.gmra.mrb[4].mxu0 %vm312_vm1, %v297_v49 }
  0xc7   : > { %803 = vmatprep.mubr.msk.f32.mxu0 %vm312_vm1, %v298_v50 }
  0xca   : > { %804 = vmatmul.mubr.msk.f32.gmra.mrb[6].mxu0 %vm312_vm1, %v299_v51 }
  0xcb   : > { %806 = vmatprep.mubr.msk.f32.mxu0 %vm312_vm1, %v300_v52 }
  0xce   : > { %807 = vmatmul.mubr.msk.f32.gmra.mrb[8].mxu0 %vm312_vm1, %v301_v53 }
  0xcf   : > { %809 = vmatprep.mubr.msk.f32.mxu0 %vm312_vm1, %v302_v54 }
  0xd2   : > { %810 = vmatmul.mubr.msk.f32.gmra.mrb[10].mxu0 %vm312_vm1, %v303_v55 }
  0xd3   : > { %812 = vmatprep.mubr.msk.f32.mxu0 %vm312_vm1, %v304_v56 }
  0xd6   : > { %813 = vmatmul.mubr.msk.f32.gmra.mrb[12].mxu0 %vm312_vm1, %v305_v57 }
  0xd7   : > { %815 = vmatprep.mubr.msk.f32.mxu0 %vm312_vm1, %v306_v58 }
  0xda   : > { %816 = vmatmul.mubr.msk.f32.gmra.mrb[14].mxu0 %vm312_vm1, %v307_v59 }
 0x191   : > { %v796_v61 = vpop.f32.mrb[0].mxu0 }
 0x192   : > { %v507_v62 = vmax.f32 %v796_v61, 0.0  ;;  %v427_v63 = vpop.f32.mrb[1].mxu0 }
 0x193   : > { %v506_v0 = vmax.f32 %v427_v63, 0.0 }
 0x195   : > { %v799_v1 = vpop.f32.mrb[2].mxu0  ;;  %v864_v2 = vpack.c.bf16 %v507_v62, %v506_v0 }
 0x196   : > { %v509_v3 = vmax.f32 %v799_v1, 0.0  ;;  %v437_v4 = vpop.f32.mrb[3].mxu0 }
 0x197   : > { %v508_v5 = vmax.f32 %v437_v4, 0.0  ;;  %865 = vmatprep.subr.bf16.mxu1 %v864_v2 }
 0x198   : > { %867 = vmatpush3.bf16.msra.mxu1 %v864_v2 }
 0x199   : > { %v868_v6 = vpack.c.bf16 %v509_v3, %v508_v5  ;;  %v802_v7 = vpop.f32.mrb[4].mxu0 }
 0x19a   : > { %v511_v8 = vmax.f32 %v802_v7, 0.0  ;;  %v447_v9 = vpop.f32.mrb[5].mxu0 }
 0x19b   : > { %v510_v10 = vmax.f32 %v447_v9, 0.0  ;;  %869 = vmatprep.subr.bf16.mxu1 %v868_v6 }
 0x19c   : > { %871 = vmatpush3.bf16.msra.mxu1 %v868_v6 }
 0x19d   : > { %v872_v11 = vpack.c.bf16 %v511_v8, %v510_v10  ;;  %v805_v12 = vpop.f32.mrb[6].mxu0 }
 0x19e   : > { %v513_v13 = vmax.f32 %v805_v12, 0.0  ;;  %v457_v14 = vpop.f32.mrb[7].mxu0 }
 0x19f   : > { %v512_v15 = vmax.f32 %v457_v14, 0.0  ;;  %873 = vmatprep.subr.bf16.mxu1 %v872_v11 }
 0x1a0   : > { %875 = vmatpush3.bf16.msra.mxu1 %v872_v11 }
 0x1a1   : > { %v876_v16 = vpack.c.bf16 %v513_v13, %v512_v15  ;;  %v808_v17 = vpop.f32.mrb[8].mxu0 }
 0x1a2   : > { %v515_v18 = vmax.f32 %v808_v17, 0.0  ;;  %v467_v19 = vpop.f32.mrb[9].mxu0 }
 0x1a3   : > { %v514_v20 = vmax.f32 %v467_v19, 0.0  ;;  %877 = vmatprep.subr.bf16.mxu1 %v876_v16 }
 0x1a4   : > { %879 = vmatpush3.bf16.msra.mxu1 %v876_v16 }
 0x1a5   : > { %v880_v21 = vpack.c.bf16 %v515_v18, %v514_v20  ;;  %v811_v22 = vpop.f32.mrb[10].mxu0 }
 0x1a6   : > { %v517_v23 = vmax.f32 %v811_v22, 0.0  ;;  %v477_v24 = vpop.f32.mrb[11].mxu0 }
 0x1a7   : > { %v516_v25 = vmax.f32 %v477_v24, 0.0  ;;  %881 = vmatprep.subr.bf16.mxu1 %v880_v21 }
 0x1a8   : > { %883 = vmatpush3.bf16.msra.mxu1 %v880_v21 }
 0x1a9   : > { %v884_v26 = vpack.c.bf16 %v517_v23, %v516_v25  ;;  %v814_v27 = vpop.f32.mrb[12].mxu0 }
 0x1aa   : > { %v519_v28 = vmax.f32 %v814_v27, 0.0  ;;  %v487_v29 = vpop.f32.mrb[13].mxu0 }
 0x1ab   : > { %v518_v30 = vmax.f32 %v487_v29, 0.0  ;;  %885 = vmatprep.subr.bf16.mxu1 %v884_v26 }
 0x1ac   : > { %887 = vmatpush3.bf16.msra.mxu1 %v884_v26 }
 0x1ad   : > { %v888_v31 = vpack.c.bf16 %v519_v28, %v518_v30  ;;  %v817_v32 = vpop.f32.mrb[14].mxu0 }
 0x1ae   : > { %v521_v33 = vmax.f32 %v817_v32, 0.0  ;;  %v497_v34 = vpop.f32.mrb[15].mxu0 }
 0x1af   : > { %v520_v35 = vmax.f32 %v497_v34, 0.0  ;;  %889 = vmatprep.subr.bf16.mxu1 %v888_v31 }
 0x1b0   : > { %891 = vmatpush3.bf16.msra.mxu1 %v888_v31 }
 0x1b1   : > { %v892_v36 = vpack.c.bf16 %v521_v33, %v520_v35 }
 0x1b3   : > { %893 = vmatprep.subr.bf16.mxu1 %v892_v36 }
 0x1b4   : > { %895 = vmatpush3.bf16.msra.mxu1 %v892_v36 }
 0x1b7   : > { %851 = vmatmul.mubr.f32.vlgmr.msra.gmra.mrb[0].mxu1 %v309_v37 }
 0x1b8   : > { %853 = vmatprep.mubr.f32.mxu1 %v310_v38 }
 0x1bb   : > { %854 = vmatmul.mubr.f32.gmra.mrb[2].mxu1 %v311_v39 }
 0x28a   : > { %v852_v40 = vpop.f32.mrb[0].mxu1 }
 0x28b   : > { %609 = vadd.xlane.f32.xlu1 %v852_v40  ;;  %v588_v41 = vpop.f32.mrb[1].mxu1 }
 0x28c   : > { %607 = vadd.xlane.f32.xlu0 %v588_v41 }
 0x28e   : > { %v855_v42 = vpop.f32.mrb[2].mxu1 }
 0x28f   : > { %613 = vadd.xlane.f32.xlu1 %v855_v42  ;;  %v598_v43 = vpop.f32.mrb[3].mxu1 }
 0x290   : > { %611 = vadd.xlane.f32.xlu0 %v598_v43 }
 0x318   : > { %v610_v44 = vpop.xlane.xlu1 %609 }
 0x319   : > { %v739_v45 = vmul.f32 -1.442695, %v610_v44  ;;  %v608_v46 = vpop.xlane.xlu0 %607 }
 0x31a   : > { %v738_v47 = vmul.f32 -1.442695, %v608_v46 }
 0x31b   : > { %920 = vpow2.f32 %v739_v45 }
 0x31c   : > { %922 = vpow2.f32 %v738_v47  ;;  %v614_v48 = vpop.xlane.xlu1 %613 }
 0x31d   : > { %v741_v49 = vmul.f32 -1.442695, %v614_v48  ;;  %v612_v50 = vpop.xlane.xlu0 %611 }
 0x31e   : > { %v740_v51 = vmul.f32 -1.442695, %v612_v50 }
 0x31f   : > { %924 = vpow2.f32 %v741_v49 }
 0x320   : > { %926 = vpow2.f32 %v740_v51 }
 0x325   : > { %v921_v52 = vpop.eup %920 }
 0x326   : > { %v923_v53 = vpop.eup %922  ;;  %v628_v54 = vadd.f32 1.0, %v921_v52 }
 0x327   : > { %v627_v55 = vadd.f32 1.0, %v923_v53 }
 0x328   : > { %928 = vrcp.f32 %v628_v54 }
 0x329   : > { %v925_v56 = vpop.eup %924  ;;  %930 = vrcp.f32 %v627_v55 }
 0x32a   : > { %v927_v57 = vpop.eup %926  ;;  %v630_v58 = vadd.f32 1.0, %v925_v56 }
 0x32b   : > { %v629_v59 = vadd.f32 1.0, %v927_v57 }
 0x32c   : > { %932 = vrcp.f32 %v630_v58 }
 0x32d   : > { %934 = vrcp.f32 %v629_v59 }
 0x332   : > { %v929_v60 = vpop.eup %928 }
 0x333   : > { %v931_v61 = vpop.eup %930  ;;  %641 = vst.msk [vmem:[%s193_s18 + $0x8] sm:$0xff] %vm639_vm4, %v929_v60 }
 0x334   : > { %640 = vst.msk [vmem:[%s193_s18] sm:$0xff] %vm639_vm4, %v931_v61 }
 0x336   : > { %v933_v62 = vpop.eup %932 }
 0x337   : > { %v935_v63 = vpop.eup %934  ;;  %643 = vst.msk [vmem:[%s193_s18 + $0x18] sm:$0xff] %vm639_vm4, %v933_v62 }
 0x338   : > { %642 = vst.msk [vmem:[%s193_s18 + $0x10] sm:$0xff] %vm639_vm4, %v935_v63 }
 0x339 PF: > { %s13_s14 = sadd.s32 1, %s958_s14   ;;  %s1124_s12 = smov %s954_s13 }
 0x33a   : > { %p10_p5 = scmp.ge.s32.totalorder %s13_s14, 4   ;;  %s1125_s13 = smov %s1127_s15 }
 0x33c   :  { %12 = sbr.rel (!%p10_p5) target bundleno = 2 (0x2), region = 74 }

</bundles_post_ra>
